<compile_context>
chip_gen: v6e
topology: v6e:2x2x1
jax: 0.10.0
libtpu: 0.0.40
codegen_flags: <defaults>
</compile_context>

<pallas_src>
import functools
import math

import jax
import jax.numpy as jnp
from jax import lax
from jax.experimental import pallas as pl
from jax.experimental.pallas import tpu as pltpu

LOG_2PI = math.log(2.0 * math.pi)


def _round_up(x, m):
    return ((x + m - 1) // m) * m


def _cdiv(a, b):
    return -(-a // b)


# ---------------------------------------------------------------------------
# Kernel
# ---------------------------------------------------------------------------
def _actor_critic_kernel(state_ref, action_ref, w1_ref, w2_ref, w3_ref,
                         consts_ref, out_ref, *, action_dim, trunk_dtype):
    A = action_dim
    consts = consts_ref[...]                      # [8, 2H] f32, resident
    b1 = consts[0:1, :]                           # [1, 2H]
    b2 = consts[1:2, :]                           # [1, 2H]
    vrow = consts[2:3, :]                         # [1, 2H]  critic head (zeros|cw3)
    b3 = consts[3:4, :A]                          # [1, A]
    inv_var = consts[4:5, :A]                     # [1, A]
    logp_c = consts[5:6, 0:1]                     # [1, 1]  -0.5*(sum log var + A*log 2pi)
    val_b = consts[5:6, 1:2]                      # [1, 1]  critic output bias

    x = state_ref[...]                            # [TB, S] (already in trunk dtype)

    # Fused actor|critic trunk: one 128-wide hidden slab per layer.
    h1 = jnp.tanh((jnp.dot(x, w1_ref[...],
                           preferred_element_type=jnp.float32) + b1
                   ).astype(trunk_dtype))         # [TB, 2H]
    h2 = jnp.tanh((jnp.dot(h1, w2_ref[...],
                           preferred_element_type=jnp.float32) + b2
                   ).astype(trunk_dtype))         # [TB, 2H]

    # Actor head in f32 (critic half of W3 is zero-padded out).
    mean = jnp.tanh(jnp.dot(h2, w3_ref[...],
                            preferred_element_type=jnp.float32) + b3)   # [TB, A]

    diff = action_ref[...] - mean                 # action stays f32 -> f32 diff
    diffsq = diff * diff                          # [TB, A]

    # Lane-dense heads: contract the feature axis against the batch-major
    # operand (NT matmul) so the batch lands on the lane axis -> [1, TB].
    nt = (((1,), (1,)), ((), ()))
    maha = lax.dot_general(inv_var, diffsq, nt,
                           preferred_element_type=jnp.float32)          # [1, TB]
    value = lax.dot_general(vrow.astype(h2.dtype), h2, nt,
                            preferred_element_type=jnp.float32)         # [1, TB]

    # Single [2, TB] lane-dense store: row 0 = logprob, row 1 = state value.
    out_ref[...] = jnp.concatenate([logp_c - 0.5 * maha, val_b + value], axis=0)


# ---------------------------------------------------------------------------
# Parameter packing (done once, outside the hot path)
# ---------------------------------------------------------------------------
def pack_fused_params(actor_params, critic_params, action_var,
                      compute_dtype=jnp.float32):
    """Pack actor/critic weights into fused, kernel-friendly tensors."""
    aw1, ab1, aw2, ab2, aw3, ab3 = actor_params
    cw1, cb1, cw2, cb2, cw3, cb3 = critic_params
    f32 = jnp.float32
    H = aw1.shape[1]
    A = aw3.shape[1]
    HH = 2 * H
    zhh = jnp.zeros((H, H), f32)

    # Fused matmul weights (the only non-tiny resident tensors).
    w1 = jnp.concatenate([aw1, cw1], axis=1).astype(compute_dtype)            # [S, 2H]
    w2 = jnp.block([[aw2, zhh], [zhh, cw2]]).astype(compute_dtype)            # [2H, 2H]
    w3 = jnp.concatenate([aw3, jnp.zeros((H, A), f32)], 0).astype(compute_dtype)  # [2H, A]

    # Single (8, 2H) f32 constant slab.
    b1_row = jnp.concatenate([ab1.reshape(H), cb1.reshape(H)])
    b2_row = jnp.concatenate([ab2.reshape(H), cb2.reshape(H)])
    v_row = jnp.concatenate([jnp.zeros((H,), f32), cw3.reshape(H)])
    b3_row = jnp.zeros((HH,), f32).at[:A].set(ab3.reshape(A))
    iv_row = jnp.zeros((HH,), f32).at[:A].set((1.0 / action_var).reshape(A))

    sum_log_var = jnp.sum(jnp.log(action_var))
    logp_const = -0.5 * (sum_log_var + A * LOG_2PI)
    sc_row = (jnp.zeros((HH,), f32)
              .at[0].set(logp_const)
              .at[1].set(cb3.reshape(())))
    zeros_row = jnp.zeros((HH,), f32)
    consts = jnp.stack([b1_row, b2_row, v_row, b3_row, iv_row, sc_row,
                        zeros_row, zeros_row], axis=0).astype(f32)            # [8, 2H]

    entropy = 0.5 * (A * (1.0 + LOG_2PI) + sum_log_var)                       # scalar

    return dict(w1=w1, w2=w2, w3=w3, consts=consts, entropy=entropy)


# ---------------------------------------------------------------------------
# Wrapper
# ---------------------------------------------------------------------------
def _pick_tile_b(B, tile_b_max):
    assert tile_b_max % 128 == 0
    if B <= 128:
        # Single exact-size tile (no ragged block, trivially fits VMEM).
        return _round_up(B, 8)
    tile = min(tile_b_max, _round_up(B, 128))
    # Keep >= 2 grid steps when the batch allows it (v7x: 2 TCs share the
    # "parallel" grid axis; a 1-step grid forfeits ~2x).
    if B > 256 and _cdiv(B, tile) < 2:
        tile = _round_up(_cdiv(B, 2), 128)
    return tile


def actor_critic_evaluate(state, action, fused, *, tile_b_max=2048,
                          compute_dtype=jnp.float32):
    """Pallas-fused ActorCritic.evaluate (continuous action space).

    Returns (action_logprobs [B], state_values [B,1], dist_entropy [B]).
    """
    B, S = state.shape
    A = action.shape[-1]

    tile_b = _pick_tile_b(B, tile_b_max)
    num_tiles = _cdiv(B, tile_b)
    b_out = num_tiles * tile_b

    # Stream state (and weights, via pack_fused_params) in the compute dtype;
    # keep the tiny action stream and the diff/Mahalanobis path in f32.
    state = state.astype(compute_dtype)
    action = action.astype(jnp.float32)

    row_map = lambda i: (i, 0)      # batch-tiled inputs (ragged last block OK)
    const_map = lambda i: (0, 0)    # weights / constants stay resident

    w1, w2, w3, consts = fused["w1"], fused["w2"], fused["w3"], fused["consts"]

    in_specs = [
        pl.BlockSpec((tile_b, S), row_map),
        pl.BlockSpec((tile_b, A), row_map),
        pl.BlockSpec(w1.shape, const_map),
        pl.BlockSpec(w2.shape, const_map),
        pl.BlockSpec(w3.shape, const_map),
        pl.BlockSpec(consts.shape, const_map),
    ]
    out_spec = pl.BlockSpec((2, tile_b), lambda i: (0, i))

    # Large tiles: bump scoped VMEM (v5e default is only 16 MiB); 32 MiB is
    # safely below v7x's 64 MiB physical VMEM.
    vmem_limit = 32 * 1024 * 1024 if tile_b >= 2048 else None

    out = pl.pallas_call(
        functools.partial(_actor_critic_kernel,
                          action_dim=A, trunk_dtype=compute_dtype),
        out_shape=jax.ShapeDtypeStruct((2, b_out), jnp.float32),
        grid=(num_tiles,),
        in_specs=in_specs,
        out_specs=out_spec,
        compiler_params=pltpu.CompilerParams(
            dimension_semantics=("parallel",),
            vmem_limit_bytes=vmem_limit),
    )(state, action, w1, w2, w3, consts)

    logp = out[0, :B]
    value = out[1, :B].reshape(B, 1)
    ent = jnp.broadcast_to(fused["entropy"], (B,))
    return logp, value, ent


# ---------------------------------------------------------------------------
# Params + pure-JAX reference
# ---------------------------------------------------------------------------
def _linear_init(key, fan_in, fan_out):
    # Mimic torch.nn.Linear default init: U(-1/sqrt(fan_in), 1/sqrt(fan_in)).
    kw, kb = jax.random.split(key)
    bound = 1.0 / math.sqrt(fan_in)
    w = jax.random.uniform(kw, (fan_in, fan_out), jnp.float32, -bound, bound)
    b = jax.random.uniform(kb, (1, fan_out), jnp.float32, -bound, bound)
    return w, b


def make_params(key, state_dim, action_dim, hidden=64):
    keys = jax.random.split(key, 6)
    aw1, ab1 = _linear_init(keys[0], state_dim, hidden)
    aw2, ab2 = _linear_init(keys[1], hidden, hidden)
    aw3, ab3 = _linear_init(keys[2], hidden, action_dim)
    cw1, cb1 = _linear_init(keys[3], state_dim, hidden)
    cw2, cb2 = _linear_init(keys[4], hidden, hidden)
    cw3, cb3 = _linear_init(keys[5], hidden, 1)
    return (aw1, ab1, aw2, ab2, aw3, ab3), (cw1, cb1, cw2, cb2, cw3, cb3)


def reference_evaluate(state, action, action_var, actor_params, critic_params):
    aw1, ab1, aw2, ab2, aw3, ab3 = actor_params
    cw1, cb1, cw2, cb2, cw3, cb3 = critic_params
    h = jnp.tanh(state @ aw1 + ab1)
    h = jnp.tanh(h @ aw2 + ab2)
    mean = jnp.tanh(h @ aw3 + ab3)
    h = jnp.tanh(state @ cw1 + cb1)
    h = jnp.tanh(h @ cw2 + cb2)
    value = h @ cw3 + cb3
    var = action_var[0]
    k = action.shape[-1]
    diff = action - mean
    logp = -0.5 * (jnp.sum(diff * diff / var, axis=-1)
                   + jnp.sum(jnp.log(var)) + k * LOG_2PI)
    ent = 0.5 * (k * (1.0 + LOG_2PI) + jnp.sum(jnp.log(var)))
    ent = jnp.broadcast_to(ent, logp.shape)
    return logp, value, ent


if __name__ == "__main__":
    # Small shapes consistent with the module: batch=8, state_dim=8, action_dim=4.
    B, STATE_DIM, ACTION_DIM = 8, 8, 4
    ACTION_STD_INIT = 0.6

    key = jax.random.PRNGKey(0)
    k_state, k_action, k_params = jax.random.split(key, 3)

    state = jax.random.normal(k_state, (B, STATE_DIM), jnp.float32)
    action = jax.random.normal(k_action, (B, ACTION_DIM), jnp.float32)
    action_var = jnp.full((1, ACTION_DIM), ACTION_STD_INIT * ACTION_STD_INIT,
                          dtype=jnp.float32)

    actor_params, critic_params = make_params(k_params, STATE_DIM, ACTION_DIM)

    # compute_dtype=jnp.bfloat16 is a further win on v6e/v7x (bf16 EUP/VPU);
    # keep f32 on v5e and for this bit-exact correctness check.
    fused = pack_fused_params(actor_params, critic_params, action_var,
                              compute_dtype=jnp.float32)

    logp, value, ent = actor_critic_evaluate(state, action, fused,
                                             compute_dtype=jnp.float32)
    jax.block_until_ready((logp, value, ent))

    logp_r, value_r, ent_r = reference_evaluate(
        state, action, action_var, actor_params, critic_params)
    assert jnp.allclose(logp, logp_r, atol=1e-4, rtol=1e-4), "logprob mismatch"
    assert jnp.allclose(value, value_r, atol=1e-4, rtol=1e-4), "value mismatch"
    assert jnp.allclose(ent, ent_r, atol=1e-5), "entropy mismatch"

    print("KERNEL_OK")
</pallas_src>

<mosaic_0001>
module attributes {stable_mosaic.version = 11 : i64} {
  func.func @_actor_critic_kernel(%arg0: i32, %arg1: memref<8x8xf32, #tpu.memory_space<vmem>>, %arg2: memref<8x4xf32, #tpu.memory_space<vmem>>, %arg3: memref<8x128xf32, #tpu.memory_space<vmem>>, %arg4: memref<128x128xf32, #tpu.memory_space<vmem>>, %arg5: memref<128x4xf32, #tpu.memory_space<vmem>>, %arg6: memref<8x128xf32, #tpu.memory_space<vmem>>, %arg7: memref<2x8xf32, #tpu.memory_space<vmem>>) attributes {dimension_semantics = [#tpu.dimension_semantics<parallel>], iteration_bounds = array<i64: 1>, scalar_prefetch = 0 : i64, scratch_operands = 0 : i64, tpu.core_type = #tpu.core_type<tc>, window_params = [{transform_indices = @transform_0, window_bounds = array<i64: 8, 8>}, {transform_indices = @transform_1, window_bounds = array<i64: 8, 4>}, {pipeline_mode = #tpu.pipeline_mode<synchronous>, transform_indices = @transform_2, window_bounds = array<i64: 8, 128>}, {pipeline_mode = #tpu.pipeline_mode<synchronous>, transform_indices = @transform_3, window_bounds = array<i64: 128, 128>}, {pipeline_mode = #tpu.pipeline_mode<synchronous>, transform_indices = @transform_4, window_bounds = array<i64: 128, 4>}, {pipeline_mode = #tpu.pipeline_mode<synchronous>, transform_indices = @transform_5, window_bounds = array<i64: 8, 128>}, {transform_indices = @transform_6, window_bounds = array<i64: 2, 8>}]} {
    %c0 = arith.constant 0 : index
    %c0_0 = arith.constant 0 : index
    %0 = vector.load %arg6[%c0, %c0_0] : memref<8x128xf32, #tpu.memory_space<vmem>>, vector<8x128xf32>
    %1 = vector.extract_strided_slice %0 {offsets = [0, 0], sizes = [1, 128], strides = [1, 1]} : vector<8x128xf32> to vector<1x128xf32>
    %2 = vector.extract_strided_slice %0 {offsets = [1, 0], sizes = [1, 128], strides = [1, 1]} : vector<8x128xf32> to vector<1x128xf32>
    %3 = vector.extract_strided_slice %0 {offsets = [2, 0], sizes = [1, 128], strides = [1, 1]} : vector<8x128xf32> to vector<1x128xf32>
    %4 = vector.extract_strided_slice %0 {offsets = [3, 0], sizes = [1, 4], strides = [1, 1]} : vector<8x128xf32> to vector<1x4xf32>
    %5 = vector.extract_strided_slice %0 {offsets = [4, 0], sizes = [1, 4], strides = [1, 1]} : vector<8x128xf32> to vector<1x4xf32>
    %6 = vector.extract_strided_slice %0 {offsets = [5, 0], sizes = [1, 1], strides = [1, 1]} : vector<8x128xf32> to vector<1x1xf32>
    %7 = vector.extract_strided_slice %0 {offsets = [5, 1], sizes = [1, 1], strides = [1, 1]} : vector<8x128xf32> to vector<1x1xf32>
    %c0_1 = arith.constant 0 : index
    %c0_2 = arith.constant 0 : index
    %8 = vector.load %arg1[%c0_1, %c0_2] : memref<8x8xf32, #tpu.memory_space<vmem>>, vector<8x8xf32>
    %c0_3 = arith.constant 0 : index
    %c0_4 = arith.constant 0 : index
    %9 = vector.load %arg3[%c0_3, %c0_4] : memref<8x128xf32, #tpu.memory_space<vmem>>, vector<8x128xf32>
    %cst = arith.constant dense<0.000000e+00> : vector<8x128xf32>
    %10 = tpu.matmul %8, %9, %cst {dimension_numbers = #tpu.dot_dimension_numbers<[1], [0], [0], [1], [0, 0, 1, 1], [], []>} : vector<8x8xf32>, vector<8x128xf32>, vector<8x128xf32> -> vector<8x128xf32>
    %11 = vector.broadcast %1 : vector<1x128xf32> to vector<8x128xf32>
    %12 = arith.addf %10, %11 : vector<8x128xf32>
    %13 = math.tanh %12 : vector<8x128xf32>
    %c0_5 = arith.constant 0 : index
    %c0_6 = arith.constant 0 : index
    %14 = vector.load %arg4[%c0_5, %c0_6] : memref<128x128xf32, #tpu.memory_space<vmem>>, vector<128x128xf32>
    %cst_7 = arith.constant dense<0.000000e+00> : vector<8x128xf32>
    %15 = tpu.matmul %13, %14, %cst_7 {dimension_numbers = #tpu.dot_dimension_numbers<[1], [0], [0], [1], [0, 0, 1, 1], [], []>} : vector<8x128xf32>, vector<128x128xf32>, vector<8x128xf32> -> vector<8x128xf32>
    %16 = vector.broadcast %2 : vector<1x128xf32> to vector<8x128xf32>
    %17 = arith.addf %15, %16 : vector<8x128xf32>
    %18 = math.tanh %17 : vector<8x128xf32>
    %c0_8 = arith.constant 0 : index
    %c0_9 = arith.constant 0 : index
    %19 = vector.load %arg5[%c0_8, %c0_9] : memref<128x4xf32, #tpu.memory_space<vmem>>, vector<128x4xf32>
    %cst_10 = arith.constant dense<0.000000e+00> : vector<8x4xf32>
    %20 = tpu.matmul %18, %19, %cst_10 {dimension_numbers = #tpu.dot_dimension_numbers<[1], [0], [0], [1], [0, 0, 1, 1], [], []>} : vector<8x128xf32>, vector<128x4xf32>, vector<8x4xf32> -> vector<8x4xf32>
    %21 = vector.broadcast %4 : vector<1x4xf32> to vector<8x4xf32>
    %22 = arith.addf %20, %21 : vector<8x4xf32>
    %23 = math.tanh %22 : vector<8x4xf32>
    %c0_11 = arith.constant 0 : index
    %c0_12 = arith.constant 0 : index
    %24 = vector.load %arg2[%c0_11, %c0_12] : memref<8x4xf32, #tpu.memory_space<vmem>>, vector<8x4xf32>
    %25 = arith.subf %24, %23 : vector<8x4xf32>
    %26 = arith.mulf %25, %25 : vector<8x4xf32>
    %cst_13 = arith.constant dense<0.000000e+00> : vector<1x8xf32>
    %27 = tpu.matmul %5, %26, %cst_13 {dimension_numbers = #tpu.dot_dimension_numbers<[1], [1], [0], [0], [0, 0, 1, 0], [], []>} : vector<1x4xf32>, vector<8x4xf32>, vector<1x8xf32> -> vector<1x8xf32>
    %cst_14 = arith.constant dense<0.000000e+00> : vector<1x8xf32>
    %28 = tpu.matmul %3, %18, %cst_14 {dimension_numbers = #tpu.dot_dimension_numbers<[1], [1], [0], [0], [0, 0, 1, 0], [], []>} : vector<1x128xf32>, vector<8x128xf32>, vector<1x8xf32> -> vector<1x8xf32>
    %cst_15 = arith.constant 5.000000e-01 : f32
    %29 = vector.broadcast %cst_15 : f32 to vector<1x8xf32>
    %30 = arith.mulf %29, %27 : vector<1x8xf32>
    %31 = vector.broadcast %6 : vector<1x1xf32> to vector<1x8xf32>
    %32 = arith.subf %31, %30 : vector<1x8xf32>
    %33 = vector.broadcast %7 : vector<1x1xf32> to vector<1x8xf32>
    %34 = arith.addf %33, %28 : vector<1x8xf32>
    %35 = tpu.concatenate %32, %34 in 0 : vector<1x8xf32>, vector<1x8xf32> -> vector<2x8xf32>
    %c0_16 = arith.constant 0 : index
    %c0_17 = arith.constant 0 : index
    %36 = vector.load %arg7[%c0_16, %c0_17] : memref<2x8xf32, #tpu.memory_space<vmem>>, vector<2x8xf32>
    tpu.vector_store %arg7[%c0_16, %c0_17], %35 {strides = array<i32>} : memref<2x8xf32, #tpu.memory_space<vmem>>, vector<2x8xf32>,
    return
  }
  func.func @transform_0(%arg0: i32) -> (i32, i32) {
    %c0_i32 = arith.constant 0 : i32
    %c0_i32_0 = arith.constant 0 : i32
    return %arg0, %c0_i32 : i32, i32
  }
  func.func @transform_1(%arg0: i32) -> (i32, i32) {
    %c0_i32 = arith.constant 0 : i32
    %c0_i32_0 = arith.constant 0 : i32
    return %arg0, %c0_i32 : i32, i32
  }
  func.func @transform_2(%arg0: i32) -> (i32, i32) {
    %c0_i32 = arith.constant 0 : i32
    %c0_i32_0 = arith.constant 0 : i32
    %c0_i32_1 = arith.constant 0 : i32
    return %c0_i32, %c0_i32_0 : i32, i32
  }
  func.func @transform_3(%arg0: i32) -> (i32, i32) {
    %c0_i32 = arith.constant 0 : i32
    %c0_i32_0 = arith.constant 0 : i32
    %c0_i32_1 = arith.constant 0 : i32
    return %c0_i32, %c0_i32_0 : i32, i32
  }
  func.func @transform_4(%arg0: i32) -> (i32, i32) {
    %c0_i32 = arith.constant 0 : i32
    %c0_i32_0 = arith.constant 0 : i32
    %c0_i32_1 = arith.constant 0 : i32
    return %c0_i32, %c0_i32_0 : i32, i32
  }
  func.func @transform_5(%arg0: i32) -> (i32, i32) {
    %c0_i32 = arith.constant 0 : i32
    %c0_i32_0 = arith.constant 0 : i32
    %c0_i32_1 = arith.constant 0 : i32
    return %c0_i32, %c0_i32_0 : i32, i32
  }
  func.func @transform_6(%arg0: i32) -> (i32, i32) {
    %c0_i32 = arith.constant 0 : i32
    %c0_i32_0 = arith.constant 0 : i32
    return %c0_i32, %arg0 : i32, i32
  }
}

</mosaic_0001>

<bundles_post_ra>
// kernel: tpu_custom_call.1
= control target key start
LH: loop header
LB: loop body
LE: loop exit
PB: predicated region body
PF: predicated region fallthrough
CT: control target
= control target key end

     0   :  { %vm31_vm0 = vcmask 64512   ;;  %v645_v3 = vmov 0.0   ;;  %vm646_vm1 = vmmov 0   ;;  %s850_s0 = inlined_call_operand.vmem [shape: f32[8,8], index: 0, kind: input, shape index: {}]   ;;  %s851_s1 = inlined_call_operand.vmem [shape: f32[8,4], index: 1, kind: input, shape index: {}]   ;;  %s852_s2 = inlined_call_operand.vmem [shape: f32[8,128], index: 2, kind: input, shape index: {}]   ;;  %s853_s3 = inlined_call_operand.vmem [shape: f32[128,128], index: 3, kind: input, shape index: {}]   ;;  %s854_s4 = inlined_call_operand.vmem [shape: f32[128,4], index: 4, kind: input, shape index: {}]   ;;  %s855_s5 = inlined_call_operand.vmem [shape: f32[8,128], index: 5, kind: input, shape index: {}]   ;;  %s856_s6 = inlined_call_operand.hbm [shape: f32[2,8], index: 6, kind: output, shape index: {}]  }
   0x1   :  { %v26_v0 = vld [vmem:[%s852_s2] sm:$0xff]  ;;  %v121_v2 = vld [vmem:[%s853_s3 + $0x78] sm:$0xff]  ;;  %525 = vmatprep.subr.mxu0 %v645_v3  ;;  %527 = vmatprep.mubr.msk.f32.mxu0 %vm646_vm1, %v645_v3  ;;  %v120_v4 = vld [vmem:[%s853_s3 + $0x70] sm:$0xff] }
   0x2   :  { %v25_v1 = vld [vmem:[%s850_s0] sm:$0xff]  ;;  %526 = vmatpush3.msra.mxu0 %v26_v0  ;;  %530 = vmatprep.subr.mxu1 %v645_v3 }
   0x3   :  { %528 = vmatmul.mubr.msk.f32.vlgmr.msra.gmra.mxu0 %vm31_vm0, %v25_v1  ;;  %531 = vmatpush3.msra.mxu1 %v121_v2 }
   0x4   :  { %11 = vsyncpa [#allocation3], 0  ;;  %532 = vmatprep.subr.mxu1 %v645_v3  ;;  %v119_v5 = vld [vmem:[%s853_s3 + $0x68] sm:$0xff]  ;;  %562 = vmatprep.mubr.msk.f32.mxu1 %vm646_vm1, %v645_v3  ;;  %v118_v6 = vld [vmem:[%s853_s3 + $0x60] sm:$0xff]  ;;  %v27_v27 = vlaneseq  ;;  %v647_v51 = vmov 0   ;;  %v648_v52 = vmov 1  }
   0x5   :  { %533 = vmatpush3.msra.mxu1 %v120_v4  ;;  %565 = vmatprep.subr.mxu0 %v645_v3  ;;  %v117_v7 = vld [vmem:[%s853_s3 + $0x58] sm:$0xff]  ;;  %v116_v8 = vld [vmem:[%s853_s3 + $0x50] sm:$0xff]  ;;  %v115_v9 = vld [vmem:[%s853_s3 + $0x48] sm:$0xff]  ;;  %vm293_vm2 = vcmask 31744   ;;  %vm464_vm3 = vcmask 1040384   ;;  %vm466_vm4 = vcmask 58368  }
   0x6   :  { %534 = vmatprep.subr.mxu1 %v645_v3  ;;  %597 = vmatprep.mubr.msk.f32.mxu0 %vm646_vm1, %v645_v3  ;;  %v114_v10 = vld [vmem:[%s853_s3 + $0x40] sm:$0xff]  ;;  %v113_v11 = vld [vmem:[%s853_s3 + $0x38] sm:$0xff]  ;;  %v112_v12 = vld [vmem:[%s853_s3 + $0x30] sm:$0xff]  ;;  %v28_v28 = vshrl.u32 %v27_v27, 7 }
   0x7   :  { %535 = vmatpush3.msra.mxu1 %v119_v5  ;;  %v111_v13 = vld [vmem:[%s853_s3 + $0x28] sm:$0xff]  ;;  %v110_v14 = vld [vmem:[%s853_s3 + $0x20] sm:$0xff]  ;;  %v109_v15 = vld [vmem:[%s853_s3 + $0x18] sm:$0xff]  ;;  %615 = vset.pattern.permute.xlu0 %v647_v51 }
   0x8   :  { %536 = vmatprep.subr.mxu1 %v645_v3  ;;  %v108_v16 = vld [vmem:[%s853_s3 + $0x10] sm:$0xff]  ;;  %v107_v17 = vld [vmem:[%s853_s3 + $0x8] sm:$0xff]  ;;  %v106_v18 = vld [vmem:[%s853_s3] sm:$0xff]  ;;  %v29_v29 = vsub.s32 0, %v28_v28  ;;  %v124_v44 = vsub.s32 1, %v28_v28  ;;  %v215_v53 = vsub.s32 3, %v28_v28 }
   0x9   :  { %537 = vmatpush3.msra.mxu1 %v118_v6  ;;  %v212_v19 = vld [vmem:[%s854_s4 + $0x78] sm:$0xff]  ;;  %v211_v20 = vld [vmem:[%s854_s4 + $0x70] sm:$0xff]  ;;  %v210_v21 = vld [vmem:[%s854_s4 + $0x68] sm:$0xff] }
   0xa   :  { %538 = vmatprep.subr.mxu1 %v645_v3  ;;  %566 = vmatpush3.msra.mxu0 %v212_v19  ;;  %v209_v22 = vld [vmem:[%s854_s4 + $0x60] sm:$0xff]  ;;  %v208_v23 = vld [vmem:[%s854_s4 + $0x58] sm:$0xff]  ;;  %v207_v24 = vld [vmem:[%s854_s4 + $0x50] sm:$0xff] }
   0xb   :  { %539 = vmatpush3.msra.mxu1 %v117_v7  ;;  %567 = vmatprep.subr.mxu0 %v645_v3  ;;  %v206_v25 = vld [vmem:[%s854_s4 + $0x48] sm:$0xff]  ;;  %v205_v26 = vld [vmem:[%s854_s4 + $0x40] sm:$0xff]  ;;  %v204_v36 = vld [vmem:[%s854_s4 + $0x38] sm:$0xff] }
   0xc   :  { %540 = vmatprep.subr.mxu1 %v645_v3  ;;  %568 = vmatpush3.msra.mxu0 %v211_v20  ;;  %v799_v30 = vld [vmem:[%s855_s5] sm:$0xff]  ;;  %v203_v37 = vld [vmem:[%s854_s4 + $0x30] sm:$0xff]  ;;  %v202_v38 = vld [vmem:[%s854_s4 + $0x28] sm:$0xff] }
   0xd   :  { %541 = vmatpush3.msra.mxu1 %v116_v8  ;;  %569 = vmatprep.subr.mxu0 %v645_v3  ;;  %v30_v31 = vrot.slane %v799_v30, %v29_v29  ;;  %v201_v39 = vld [vmem:[%s854_s4 + $0x20] sm:$0xff]  ;;  %v200_v40 = vld [vmem:[%s854_s4 + $0x18] sm:$0xff]  ;;  %v199_v41 = vld [vmem:[%s854_s4 + $0x10] sm:$0xff]  ;;  %v125_v45 = vrot.slane %v799_v30, %v124_v44  ;;  %v369_v50 = vrot.slane %v799_v30, 2  ;;  %v216_v54 = vrot.slane %v799_v30, %v215_v53 }
   0xe   :  { %542 = vmatprep.subr.mxu1 %v645_v3  ;;  %570 = vmatpush3.msra.mxu0 %v210_v21  ;;  %v198_v42 = vld [vmem:[%s854_s4 + $0x8] sm:$0xff]  ;;  %v197_v43 = vld [vmem:[%s854_s4] sm:$0xff]  ;;  %v292_v62 = vrot.slane %v799_v30, 4 }
   0xf   :  { %543 = vmatpush3.msra.mxu1 %v115_v9  ;;  %571 = vmatprep.subr.mxu0 %v645_v3  ;;  %v288_v58 = vld [vmem:[%s851_s1] sm:$0xff]  ;;  %s649_s1 = smov [#allocation2]  }
  0x10   :  { %544 = vmatprep.subr.mxu1 %v645_v3  ;;  %572 = vmatpush3.msra.mxu0 %v209_v22  ;;  %s474_s11 = sshll.u32 %s649_s1, 4  ;;  %s475_s11 = int_to_ptr.vmem [resolvable:$true] %s474_s11 }
  0x11   :  { %545 = vmatpush3.msra.mxu1 %v114_v10  ;;  %573 = vmatprep.subr.mxu0 %v645_v3  ;;  %s623_s12 = scalar_lea.vmem %s475_s11, 32  ;;  %p628_p1 = scmp.lt.s32.totalorder %s475_s11, %s475_s11 }
  0x12   :  { %546 = vmatprep.subr.mxu1 %v645_v3  ;;  %574 = vmatpush3.msra.mxu0 %v208_v23  ;;  %p624_p0 = scmp.ne.s32.totalorder %s475_s11, %s623_s12  ;;  %p629_p2 = scmp.lt.s32.totalorder %s623_s12, %s623_s12 }
  0x13   :  { %547 = vmatpush3.msra.mxu1 %v113_v11  ;;  %575 = vmatprep.subr.mxu0 %v645_v3 }
  0x14   :  { %548 = vmatprep.subr.mxu1 %v645_v3  ;;  %576 = vmatpush3.msra.mxu0 %v207_v24  ;;  %p630_p3 = por %p629_p2, %p628_p1 }
  0x15   :  { %549 = vmatpush3.msra.mxu1 %v112_v12  ;;  %577 = vmatprep.subr.mxu0 %v645_v3 }
  0x16   :  { %550 = vmatprep.subr.mxu1 %v645_v3  ;;  %578 = vmatpush3.msra.mxu0 %v206_v25  ;;  %p631_p4 = pnand %p630_p3, %p624_p0 }
  0x17   :  { %551 = vmatpush3.msra.mxu1 %v111_v13  ;;  %579 = vmatprep.subr.mxu0 %v645_v3 }
  0x18   :  { %552 = vmatprep.subr.mxu1 %v645_v3  ;;  %580 = vmatpush3.msra.mxu0 %v205_v26 }
  0x19   :  { %553 = vmatpush3.msra.mxu1 %v110_v14  ;;  %581 = vmatprep.subr.mxu0 %v645_v3 }
  0x1a   :  { %554 = vmatprep.subr.mxu1 %v645_v3  ;;  %582 = vmatpush3.msra.mxu0 %v204_v36 }
  0x1b   :  { %555 = vmatpush3.msra.mxu1 %v109_v15  ;;  %583 = vmatprep.subr.mxu0 %v645_v3 }
  0x1c   :  { %556 = vmatprep.subr.mxu1 %v645_v3  ;;  %584 = vmatpush3.msra.mxu0 %v203_v37 }
  0x1d   :  { %557 = vmatpush3.msra.mxu1 %v108_v16  ;;  %585 = vmatprep.subr.mxu0 %v645_v3 }
  0x1e   :  { %558 = vmatprep.subr.mxu1 %v645_v3  ;;  %586 = vmatpush3.msra.mxu0 %v202_v38 }
  0x1f   :  { %559 = vmatpush3.msra.mxu1 %v107_v17  ;;  %587 = vmatprep.subr.mxu0 %v645_v3 }
  0x20   :  { %560 = vmatprep.subr.mxu1 %v645_v3  ;;  %588 = vmatpush3.msra.mxu0 %v201_v39 }
  0x21   :  { %561 = vmatpush3.msra.mxu1 %v106_v18  ;;  %589 = vmatprep.subr.mxu0 %v645_v3 }
  0x22   :  { %600 = vmatprep.subr.mxu1 %v645_v3  ;;  %590 = vmatpush3.msra.mxu0 %v200_v40 }
  0x23   :  { %591 = vmatprep.subr.mxu0 %v645_v3  ;;  %443 = vperm.xlu0 %615, %v799_v30  }
  0x24   :  { %592 = vmatpush3.msra.mxu0 %v199_v41 }
  0x25   :  { %593 = vmatprep.subr.mxu0 %v645_v3 }
  0x26   :  { %594 = vmatpush3.msra.mxu0 %v198_v42 }
  0x27   :  { %595 = vmatprep.subr.mxu0 %v645_v3  ;;  %616 = vset.pattern.permute.xlu0 %v648_v52 }
  0x28   :  { %596 = vmatpush3.msra.mxu0 %v197_v43  ;;  %451 = vperm.xlu0 %616, %v799_v30  }
  0x29   :  { %605 = vmatprep.subr.mxu0 %v645_v3 }
  0x9e   :  { %v444_v1 = vpop.permute.xlu0 %443 }
  0xc3   :  { %v101_v32 = vpop.f32.mrf.mxu0 }
  0xc4   :  { %v102_v33 = vadd.f32 %v101_v32, %v30_v31 }
  0xc5   :  { %v529_v34 = vpop.f32.mrf.mxu0 }
  0xc6   :  { %617 = vtanh.f32 %v102_v33 }
  0xd3   :  { %v618_v35 = vpop.eup %617 }
  0xd4   :  { %563 = vmatmul.mubr.f32.vlgmr.msra.gmra.mxu1 %v618_v35 }
  0xd5   :  { %602 = vmatprep.mubr.msk.f32.mxu1 %vm646_vm1, %v645_v3 }
 0x194   :  { %v192_v46 = vpop.f32.mrf.mxu1 }
 0x195   :  { %v193_v47 = vadd.f32 %v192_v46, %v125_v45 }
 0x196   :  { %v564_v48 = vpop.f32.mrf.mxu1 }
 0x197   :  { %619 = vtanh.f32 %v193_v47 }
 0x1a4   :  { %v620_v49 = vpop.eup %619 }
 0x1a5   :  { %598 = vmatmul.mubr.f32.vlgmr.msra.gmra.mxu0 %v620_v49 }
 0x1a6   :  { %606 = vmatpush3.xpose.msra.mxu0 %v620_v49  ;;  %607 = vmatprep.mubr.msk.f32.mxu0 %vm646_vm1, %v645_v3  ;;  %v452_v3 = vpop.permute.xlu0 %451 }
 0x1a9   :  { %608 = vmatmul.mubr.f32.vlgmr.msra.gmra.mxu0 %v369_v50 }
 0x265   :  { %v283_v55 = vpop.f32.mrf.mxu0 }
 0x266   :  { %v284_v56 = vadd.f32 %v283_v55, %v216_v54 }
 0x267   :  { %v599_v57 = vpop.f32.mrf.mxu0 }
 0x268   :  { %621 = vtanh.f32 %v284_v56 }
 0x269   :  { %v437_v63 = vpop.f32.mrf.mxu0 }
 0x26a   :  { %v455_v2 = vrot.slane %v437_v63, 3 }
 0x26b   :  { %v609_v0 = vpop.f32.mrf.mxu0 }
 0x26c   :  { %v457_v6 = vadd.f32 %v455_v2, %v452_v3 }
 0x26e   :  { %v462_v10 = vrot.slane %v457_v6, 4 }
 0x275   :  { %v622_v59 = vpop.eup %621 }
 0x276   :  { %v289_v60 = vsub.f32 %v288_v58, %v622_v59 }
 0x278   :  { %v290_v61 = vmul.f32 %v289_v60, %v289_v60 }
 0x27a   :  { %601 = vmatpush3.xpose.msk.msra.mxu1 %vm293_vm2, %v290_v61 }
 0x27d   :  { %603 = vmatmul.mubr.msk.f32.vlgmr.msra.gmra.mxu1 %vm293_vm2, %v292_v62 }
 0x33d   :  { %v365_v4 = vpop.f32.mrf.mxu1 }
 0x33e   :  { %v441_v5 = vmul.f32 0.5, %v365_v4 }
 0x33f   :  { %v604_v7 = vpop.f32.mrf.mxu1 }
 0x340   :  { %v447_v8 = vrot.slane %v441_v5, 3 }
 0x342   :  { %v449_v9 = vsub.f32 %v444_v1, %v447_v8 }
 0x344   :  { %v459_v11 = vrot.slane %v449_v9, 5 }
 0x346   :  { %v465_v12 = vsel %vm464_vm3, %v459_v11, %v462_v10 }
 0x347   :  { %467 = vst.msk [vmem:[#allocation2] sm:$0x3] %vm466_vm4, %v465_v12 }
 0x348   :  { %634 = shalt.err (!%p631_p4)
}
 0x349   :  { %477 = dma.vmem_to_hbm [thread:$0]  %s475_s11, 32, %s856_s6, [#allocation3]  }
 0x34a   :  { %643 = dma.done.wait [#allocation3], 32  }
 0x34b   :  { %644 = vsyncadd [#allocation3], 4294967264 }
 0x34c   :  { %481 = vsyncpa [#allocation3], 1 }

</bundles_post_ra>
